<compile_context>
chip_gen: v7x
topology: tpu7x:2x2x1
jax: 0.10.0
libtpu: 0.0.40
codegen_flags: <defaults>
</compile_context>

<pallas_src>
import functools

import jax
import jax.numpy as jnp
import numpy as np
from jax.experimental import pallas as pl
from jax.experimental.pallas import tpu as pltpu


def _fold_to_128(x):
    """(C, n) -> (C, 128): sum 128-lane groups with vreg-aligned VPU adds."""
    n = x.shape[1]
    acc = x[:, 0:128]
    for j in range(1, n // 128):
        acc = acc + x[:, j * 128:(j + 1) * 128]
    return acc


def _dice_partial_kernel(pred_ref, tgt_ref, out_ref, num_acc, den_acc, *,
                         exponent, ignore_index, chunk, valid_s, n_s_inner):
    """grid = (B, n_super, n_s); emits per-(b, super) per-class (num, den)."""
    u = pl.program_id(1)
    s = pl.program_id(2)

    C = pred_ref.shape[1]
    tile = pred_ref.shape[2]
    n_chunks = tile // chunk

    @pl.when(s == 0)
    def _():
        num_acc[...] = jnp.zeros_like(num_acc)
        den_acc[...] = jnp.zeros_like(den_acc)

    # Element offset of this block along the flattened spatial axis.
    base = (u * n_s_inner + s) * tile
    # Hoisted lane iota (broadcast_in_dim is not CSE'd if placed in the loop).
    lane = jax.lax.broadcasted_iota(jnp.int32, (1, chunk), 1)

    def chunk_body(ci, carry):
        num_c, den_c = carry
        off = ci * chunk
        if not isinstance(off, int):
            off = pl.multiple_of(off, 128)

        p = pred_ref[0, :, pl.ds(off, chunk)].astype(jnp.float32)   # (C, chunk)
        t = tgt_ref[0, :, pl.ds(off, chunk)]                        # (1, chunk)

        # Validity: inside the real spatial extent AND not ignore_index.
        in_range = lane < (valid_s - base - off)                    # (1, chunk)
        valid = jnp.logical_and(in_range, t != ignore_index)        # (1, chunk)

        # Softmax over the class (sublane) axis.
        m = jnp.max(p, axis=0, keepdims=True)                       # (1, chunk)
        e = jnp.exp(p - m)                                          # (C, chunk)
        z = jnp.sum(e, axis=0, keepdims=True)                       # (1, chunk)
        r = pl.reciprocal(z, approx=True)                           # EUP slot
        r = r * (2.0 - z * r)        # one Newton step -> ~f32 accuracy
        sm = e * r                                                  # (C, chunk)

        cls = jax.lax.broadcasted_iota(jnp.int32, (C, chunk), 0)
        t_cl = jnp.clip(t, 0, C - 1)
        hit = jnp.logical_and(cls == t_cl, valid)                   # (C, chunk)

        # where-selects (not float-mask multiplies): fewer VALU ops and they
        # scrub garbage/NaN columns in the never-padded ragged tail block.
        num_p = jnp.where(hit, sm, 0.0)          # softmax * onehot * valid
        onehot = jnp.where(hit, 1.0, 0.0)        # onehot**exponent == onehot
        if exponent == 2:
            sm_v = jnp.where(valid, sm, 0.0)
            p_pow = sm_v * sm_v
        else:
            p_pow = jnp.where(valid, sm ** exponent, 0.0)

        num_c = num_c + _fold_to_128(num_p)
        den_c = den_c + _fold_to_128(p_pow + onehot)
        return num_c, den_c

    zero = jnp.zeros((C, 128), jnp.float32)
    if n_chunks == 1:
        num_c, den_c = chunk_body(0, (zero, zero))
    else:
        unroll = 1
        for cand in (8, 4, 2):
            if n_chunks % cand == 0:
                unroll = cand
                break
        num_c, den_c = jax.lax.fori_loop(0, n_chunks, chunk_body, (zero, zero),
                                         unroll=unroll)

    num_acc[...] += num_c
    den_acc[...] += den_c

    @pl.when(s == pl.num_programs(2) - 1)
    def _():
        nums = jnp.sum(num_acc[...], axis=1, keepdims=True)          # (C, 1)
        dens = jnp.sum(den_acc[...], axis=1, keepdims=True)          # (C, 1)
        col = jax.lax.broadcasted_iota(jnp.int32, (C, 2), 1)
        out_ref[0, 0] = jnp.where(col == 0, nums, dens)              # one store


def _choose_tiling(num_classes, spatial):
    """(chunk, tile): chunk = lane sub-chunk whose (C, chunk) temporaries fit
    in vregs; tile = HBM block (multiple of chunk, ~2 MiB of f32 pred, never
    larger than the spatial extent unless the whole extent is tiny)."""
    c = max(num_classes, 1)
    chunk = max(128, min(512, ((4096 // c) // 128) * 128))
    if spatial < chunk:
        # Tiny spatial extent: one small block; the <=127-column pad done by
        # the wrapper is negligible because the whole array is tiny.
        side = max(128, ((spatial + 127) // 128) * 128)
        return side, side
    target_lanes = min(128 * 1024, (2 * 1024 * 1024) // (4 * c))
    tile = max(chunk, (target_lanes // chunk) * chunk)
    tile = min(tile, (spatial // chunk) * chunk)   # block never exceeds array
    return chunk, tile


def dice_loss_pallas(pred, target, *, smooth=1.0, exponent=2, loss_weight=1.0,
                     ignore_index=-1, vmem_limit_bytes=32 * 1024 * 1024):
    """pred: (B, C, *spatial) float (f32/bf16); target: (B, *spatial) int."""
    B, C = pred.shape[0], pred.shape[1]
    S = int(np.prod(pred.shape[2:])) if pred.ndim > 2 else 1

    # Native-layout reshapes only (free: no transpose, no extra HBM pass).
    pred3 = pred.reshape(B, C, S)
    tgt3 = target.reshape(B, 1, S).astype(jnp.int32)

    chunk, tile = _choose_tiling(C, S)
    if S < tile:                       # only when S < one 128-lane chunk
        pad = tile - S
        pred3 = jnp.pad(pred3, ((0, 0), (0, 0), (0, pad)))
        tgt3 = jnp.pad(tgt3, ((0, 0), (0, 0), (0, pad)),
                       constant_values=ignore_index)
    s_len = pred3.shape[2]
    n_blocks = (s_len + tile - 1) // tile          # ragged last block is masked

    # v7x megacore: with B == 1 split the spatial axis into 2 parallel
    # super-chunks (only when the split is exact; no-op on 1-TC chips).
    n_super = 2 if (B == 1 and n_blocks >= 2 and n_blocks % 2 == 0) else 1
    n_s = n_blocks // n_super

    kernel = functools.partial(
        _dice_partial_kernel,
        exponent=exponent,
        ignore_index=int(ignore_index),
        chunk=chunk,
        valid_s=S,
        n_s_inner=n_s)

    # partial[b, u, c, 0] = sum_valid(softmax_c * onehot_c)
    # partial[b, u, c, 1] = sum_valid(softmax_c**exponent + onehot_c)
    partial = pl.pallas_call(
        kernel,
        out_shape=jax.ShapeDtypeStruct((B, n_super, C, 2), jnp.float32),
        grid_spec=pltpu.PrefetchScalarGridSpec(
            num_scalar_prefetch=0,
            grid=(B, n_super, n_s),
            in_specs=[
                pl.BlockSpec((1, C, tile),
                             lambda b, u, s: (b, 0, u * n_s + s)),
                pl.BlockSpec((1, 1, tile),
                             lambda b, u, s: (b, 0, u * n_s + s)),
            ],
            out_specs=pl.BlockSpec((1, 1, C, 2),
                                   lambda b, u, s: (b, u, 0, 0)),
            scratch_shapes=[
                pltpu.VMEM((C, 128), jnp.float32),   # per-class numerator acc
                pltpu.VMEM((C, 128), jnp.float32),   # per-class denominator acc
            ],
        ),
        compiler_params=pltpu.CompilerParams(
            dimension_semantics=("parallel", "parallel", "arbitrary"),
            vmem_limit_bytes=vmem_limit_bytes),
    )(pred3, tgt3)

    # Tiny final reduction in plain JAX (keeps the parallel axes megacore-able).
    num = 2.0 * jnp.sum(partial[..., 0], axis=(0, 1)) + smooth    # (C,)
    den = jnp.sum(partial[..., 1], axis=(0, 1)) + smooth          # (C,)
    per_class = 1.0 - num / den
    # pointcept skips class i == ignore_index but still divides by num_classes.
    class_mask = jnp.arange(C) != ignore_index
    return loss_weight * jnp.sum(jnp.where(class_mask, per_class, 0.0)) / C


def dice_loss_reference(pred, target, *, smooth=1.0, exponent=2,
                        loss_weight=1.0, ignore_index=-1):
    C = pred.shape[1]
    pred2d = jnp.moveaxis(pred, 1, -1).reshape(-1, C).astype(jnp.float32)
    tgt = target.reshape(-1).astype(jnp.int32)
    valid = (tgt != ignore_index).astype(jnp.float32)[:, None]
    sm = jax.nn.softmax(pred2d, axis=1)
    onehot = jax.nn.one_hot(jnp.clip(tgt, 0, C - 1), C)
    num = 2.0 * jnp.sum(sm * onehot * valid, axis=0) + smooth
    den = jnp.sum((sm ** exponent + onehot ** exponent) * valid, axis=0) + smooth
    per_class = 1.0 - num / den
    class_mask = jnp.arange(C) != ignore_index
    return loss_weight * jnp.sum(jnp.where(class_mask, per_class, 0.0)) / C


if __name__ == "__main__":
    key = jax.random.PRNGKey(0)
    k1, k2 = jax.random.split(key)
    B, C, H, W = 2, 4, 16, 16
    pred = jax.random.normal(k1, (B, C, H, W), dtype=jnp.float32)
    # targets in [0, C-1] with some ignore_index (-1) entries
    target = jax.random.randint(k2, (B, H, W), minval=-1, maxval=C,
                                dtype=jnp.int32)

    loss = dice_loss_pallas(pred, target)
    loss = jax.block_until_ready(loss)

    ref = dice_loss_reference(pred, target)
    assert np.allclose(np.asarray(loss), np.asarray(ref), rtol=5e-4, atol=5e-4), \
        (float(loss), float(ref))

    print("KERNEL_OK")
</pallas_src>

<mosaic_0001>
module attributes {stable_mosaic.version = 11 : i64} {
  func.func @_dice_partial_kernel(%arg0: i32, %arg1: i32, %arg2: i32, %arg3: memref<1x4x256xf32, #tpu.memory_space<vmem>>, %arg4: memref<1x1x256xi32, #tpu.memory_space<vmem>>, %arg5: memref<1x1x4x2xf32, #tpu.memory_space<vmem>>, %arg6: memref<4x128xf32, #tpu.memory_space<vmem>>, %arg7: memref<4x128xf32, #tpu.memory_space<vmem>>) attributes {dimension_semantics = [#tpu.dimension_semantics<parallel>, #tpu.dimension_semantics<parallel>, #tpu.dimension_semantics<arbitrary>], iteration_bounds = array<i64: 2, 1, 1>, scalar_prefetch = 0 : i64, scratch_operands = 2 : i64, tpu.core_type = #tpu.core_type<tc>, window_params = [{transform_indices = @transform_0, window_bounds = array<i64: 1, 4, 256>}, {transform_indices = @transform_1, window_bounds = array<i64: 1, 1, 256>}, {transform_indices = @transform_2, window_bounds = array<i64: 1, 1, 4, 2>}]} {
    %c0_i32 = arith.constant 0 : i32
    %0 = arith.cmpi eq, %arg2, %c0_i32 : i32
    %1 = arith.extui %0 : i1 to i32
    %c0_i32_0 = arith.constant 0 : i32
    %2 = arith.cmpi ne, %1, %c0_i32_0 : i32
    scf.if %2 {
      %cst_26 = arith.constant 0.000000e+00 : f32
      %70 = vector.broadcast %cst_26 : f32 to vector<4x128xf32>
      %c0_27 = arith.constant 0 : index
      %c0_28 = arith.constant 0 : index
      %71 = vector.load %arg6[%c0_27, %c0_28] : memref<4x128xf32, #tpu.memory_space<vmem>>, vector<4x128xf32>
      tpu.vector_store %arg6[%c0_27, %c0_28], %70 {strides = array<i32>} : memref<4x128xf32, #tpu.memory_space<vmem>>, vector<4x128xf32>,
      %cst_29 = arith.constant 0.000000e+00 : f32
      %72 = vector.broadcast %cst_29 : f32 to vector<4x128xf32>
      %c0_30 = arith.constant 0 : index
      %c0_31 = arith.constant 0 : index
      %73 = vector.load %arg7[%c0_30, %c0_31] : memref<4x128xf32, #tpu.memory_space<vmem>>, vector<4x128xf32>
      tpu.vector_store %arg7[%c0_30, %c0_31], %72 {strides = array<i32>} : memref<4x128xf32, #tpu.memory_space<vmem>>, vector<4x128xf32>,
    } else {
    }
    %c1_i32 = arith.constant 1 : i32
    %3 = arith.muli %arg1, %c1_i32 : i32
    %4 = arith.addi %3, %arg2 : i32
    %c256_i32 = arith.constant 256 : i32
    %5 = arith.muli %4, %c256_i32 : i32
    %6 = tpu.iota {dimensions = array<i32: 1>} : vector<1x256xi32>
    %cst = arith.constant 0.000000e+00 : f32
    %7 = vector.broadcast %cst : f32 to vector<4x128xf32>
    %c0 = arith.constant 0 : index
    %c0_1 = arith.constant 0 : index
    %c0_2 = arith.constant 0 : index
    %8 = vector.load %arg3[%c0, %c0_1, %c0_2] : memref<1x4x256xf32, #tpu.memory_space<vmem>>, vector<1x4x256xf32>
    %9 = vector.shape_cast %8 : vector<1x4x256xf32> to vector<4x256xf32>
    %c0_3 = arith.constant 0 : index
    %c0_4 = arith.constant 0 : index
    %c0_5 = arith.constant 0 : index
    %10 = vector.load %arg4[%c0_3, %c0_4, %c0_5] : memref<1x1x256xi32, #tpu.memory_space<vmem>>, vector<1x1x256xi32>
    %11 = vector.shape_cast %10 : vector<1x1x256xi32> to vector<1x256xi32>
    %c256_i32_6 = arith.constant 256 : i32
    %12 = arith.subi %c256_i32_6, %5 : i32
    %c0_i32_7 = arith.constant 0 : i32
    %13 = arith.subi %12, %c0_i32_7 : i32
    %14 = vector.broadcast %13 : i32 to vector<1x256xi32>
    %15 = arith.cmpi slt, %6, %14 : vector<1x256xi32>
    %c-1_i32 = arith.constant -1 : i32
    %16 = vector.broadcast %c-1_i32 : i32 to vector<1x256xi32>
    %17 = arith.cmpi ne, %11, %16 : vector<1x256xi32>
    %18 = arith.andi %15, %17 : vector<1x256xi1>
    %cst_8 = arith.constant dense<0xFF800000> : vector<256xf32>
    %19 = vector.multi_reduction <maximumf>, %9, %cst_8 [0] : vector<4x256xf32> to vector<256xf32>
    %20 = vector.shape_cast %19 : vector<256xf32> to vector<1x256xf32>
    %21 = vector.broadcast %20 : vector<1x256xf32> to vector<4x256xf32>
    %22 = arith.subf %9, %21 : vector<4x256xf32>
    %23 = math.exp %22 : vector<4x256xf32>
    %cst_9 = arith.constant dense<0.000000e+00> : vector<256xf32>
    %24 = vector.multi_reduction <add>, %23, %cst_9 [0] : vector<4x256xf32> to vector<256xf32>
    %25 = vector.shape_cast %24 : vector<256xf32> to vector<1x256xf32>
    %26 = tpu.reciprocal %25 {approx = true} : vector<1x256xf32> -> vector<1x256xf32>
    %27 = arith.mulf %25, %26 : vector<1x256xf32>
    %cst_10 = arith.constant 2.000000e+00 : f32
    %28 = vector.broadcast %cst_10 : f32 to vector<1x256xf32>
    %29 = arith.subf %28, %27 : vector<1x256xf32>
    %30 = arith.mulf %26, %29 : vector<1x256xf32>
    %31 = vector.broadcast %30 : vector<1x256xf32> to vector<4x256xf32>
    %32 = arith.mulf %23, %31 : vector<4x256xf32>
    %33 = tpu.iota {dimensions = array<i32: 0>} : vector<4x256xi32>
    %c0_i32_11 = arith.constant 0 : i32
    %c3_i32 = arith.constant 3 : i32
    %34 = vector.broadcast %c0_i32_11 : i32 to vector<1x256xi32>
    %35 = arith.maxsi %34, %11 : vector<1x256xi32>
    %36 = vector.broadcast %c3_i32 : i32 to vector<1x256xi32>
    %37 = arith.minsi %36, %35 : vector<1x256xi32>
    %38 = vector.broadcast %37 : vector<1x256xi32> to vector<4x256xi32>
    %39 = arith.cmpi eq, %33, %38 : vector<4x256xi32>
    %40 = vector.broadcast %18 : vector<1x256xi1> to vector<4x256xi1>
    %41 = arith.andi %39, %40 : vector<4x256xi1>
    %cst_12 = arith.constant 0.000000e+00 : f32
    %42 = vector.broadcast %cst_12 : f32 to vector<4x256xf32>
    %43 = arith.select %41, %32, %42 : vector<4x256xi1>, vector<4x256xf32>
    %cst_13 = arith.constant 1.000000e+00 : f32
    %cst_14 = arith.constant 0.000000e+00 : f32
    %44 = vector.broadcast %cst_13 : f32 to vector<4x256xf32>
    %45 = vector.broadcast %cst_14 : f32 to vector<4x256xf32>
    %46 = arith.select %41, %44, %45 : vector<4x256xi1>, vector<4x256xf32>
    %cst_15 = arith.constant 0.000000e+00 : f32
    %47 = vector.shape_cast %18 : vector<1x256xi1> to vector<1x256xi1>
    %48 = vector.broadcast %47 : vector<1x256xi1> to vector<4x256xi1>
    %49 = vector.broadcast %cst_15 : f32 to vector<4x256xf32>
    %50 = arith.select %48, %32, %49 : vector<4x256xi1>, vector<4x256xf32>
    %51 = arith.mulf %50, %50 : vector<4x256xf32>
    %52 = vector.extract_strided_slice %43 {offsets = [0, 0], sizes = [4, 128], strides = [1, 1]} : vector<4x256xf32> to vector<4x128xf32>
    %53 = vector.extract_strided_slice %43 {offsets = [0, 128], sizes = [4, 128], strides = [1, 1]} : vector<4x256xf32> to vector<4x128xf32>
    %54 = arith.addf %52, %53 : vector<4x128xf32>
    %55 = arith.addf %7, %54 : vector<4x128xf32>
    %56 = arith.addf %51, %46 : vector<4x256xf32>
    %57 = vector.extract_strided_slice %56 {offsets = [0, 0], sizes = [4, 128], strides = [1, 1]} : vector<4x256xf32> to vector<4x128xf32>
    %58 = vector.extract_strided_slice %56 {offsets = [0, 128], sizes = [4, 128], strides = [1, 1]} : vector<4x256xf32> to vector<4x128xf32>
    %59 = arith.addf %57, %58 : vector<4x128xf32>
    %60 = arith.addf %7, %59 : vector<4x128xf32>
    %c0_16 = arith.constant 0 : index
    %c0_17 = arith.constant 0 : index
    %61 = vector.load %arg6[%c0_16, %c0_17] : memref<4x128xf32, #tpu.memory_space<vmem>>, vector<4x128xf32>
    %62 = arith.addf %61, %55 : vector<4x128xf32>
    %c0_18 = arith.constant 0 : index
    %c0_19 = arith.constant 0 : index
    %63 = vector.load %arg6[%c0_18, %c0_19] : memref<4x128xf32, #tpu.memory_space<vmem>>, vector<4x128xf32>
    tpu.vector_store %arg6[%c0_18, %c0_19], %62 {strides = array<i32>} : memref<4x128xf32, #tpu.memory_space<vmem>>, vector<4x128xf32>,
    %c0_20 = arith.constant 0 : index
    %c0_21 = arith.constant 0 : index
    %64 = vector.load %arg7[%c0_20, %c0_21] : memref<4x128xf32, #tpu.memory_space<vmem>>, vector<4x128xf32>
    %65 = arith.addf %64, %60 : vector<4x128xf32>
    %c0_22 = arith.constant 0 : index
    %c0_23 = arith.constant 0 : index
    %66 = vector.load %arg7[%c0_22, %c0_23] : memref<4x128xf32, #tpu.memory_space<vmem>>, vector<4x128xf32>
    tpu.vector_store %arg7[%c0_22, %c0_23], %65 {strides = array<i32>} : memref<4x128xf32, #tpu.memory_space<vmem>>, vector<4x128xf32>,
    %c0_i32_24 = arith.constant 0 : i32
    %67 = arith.cmpi eq, %arg2, %c0_i32_24 : i32
    %68 = arith.extui %67 : i1 to i32
    %c0_i32_25 = arith.constant 0 : i32
    %69 = arith.cmpi ne, %68, %c0_i32_25 : i32
    scf.if %69 {
      %c0_26 = arith.constant 0 : index
      %c0_27 = arith.constant 0 : index
      %70 = vector.load %arg6[%c0_26, %c0_27] : memref<4x128xf32, #tpu.memory_space<vmem>>, vector<4x128xf32>
      %cst_28 = arith.constant dense<0.000000e+00> : vector<4xf32>
      %71 = vector.multi_reduction <add>, %70, %cst_28 [1] : vector<4x128xf32> to vector<4xf32>
      %72 = vector.shape_cast %71 : vector<4xf32> to vector<4x1xf32>
      %c0_29 = arith.constant 0 : index
      %c0_30 = arith.constant 0 : index
      %73 = vector.load %arg7[%c0_29, %c0_30] : memref<4x128xf32, #tpu.memory_space<vmem>>, vector<4x128xf32>
      %cst_31 = arith.constant dense<0.000000e+00> : vector<4xf32>
      %74 = vector.multi_reduction <add>, %73, %cst_31 [1] : vector<4x128xf32> to vector<4xf32>
      %75 = vector.shape_cast %74 : vector<4xf32> to vector<4x1xf32>
      %76 = tpu.iota {dimensions = array<i32: 1>} : vector<4x2xi32>
      %c0_i32_32 = arith.constant 0 : i32
      %77 = vector.broadcast %c0_i32_32 : i32 to vector<4x2xi32>
      %78 = arith.cmpi eq, %76, %77 : vector<4x2xi32>
      %79 = vector.shape_cast %72 : vector<4x1xf32> to vector<4x1xf32>
      %80 = vector.broadcast %79 : vector<4x1xf32> to vector<4x2xf32>
      %81 = vector.shape_cast %75 : vector<4x1xf32> to vector<4x1xf32>
      %82 = vector.broadcast %81 : vector<4x1xf32> to vector<4x2xf32>
      %83 = arith.select %78, %80, %82 : vector<4x2xi1>, vector<4x2xf32>
      %c0_33 = arith.constant 0 : index
      %c0_34 = arith.constant 0 : index
      %c0_35 = arith.constant 0 : index
      %c0_36 = arith.constant 0 : index
      %84 = vector.load %arg5[%c0_33, %c0_34, %c0_35, %c0_36] : memref<1x1x4x2xf32, #tpu.memory_space<vmem>>, vector<1x1x4x2xf32>
      %85 = vector.shape_cast %84 : vector<1x1x4x2xf32> to vector<4x2xf32>
      %86 = vector.shape_cast %83 : vector<4x2xf32> to vector<1x1x4x2xf32>
      tpu.vector_store %arg5[%c0_33, %c0_34, %c0_35, %c0_36], %86 {strides = array<i32>} : memref<1x1x4x2xf32, #tpu.memory_space<vmem>>, vector<1x1x4x2xf32>,
    } else {
    }
    return
  }
  func.func @transform_0(%arg0: i32, %arg1: i32, %arg2: i32) -> (i32, i32, i32) {
    %c1_i32 = arith.constant 1 : i32
    %0 = arith.muli %arg1, %c1_i32 : i32
    %1 = arith.addi %0, %arg2 : i32
    %c0_i32 = arith.constant 0 : i32
    %c0_i32_0 = arith.constant 0 : i32
    return %arg0, %c0_i32, %1 : i32, i32, i32
  }
  func.func @transform_1(%arg0: i32, %arg1: i32, %arg2: i32) -> (i32, i32, i32) {
    %c1_i32 = arith.constant 1 : i32
    %0 = arith.muli %arg1, %c1_i32 : i32
    %1 = arith.addi %0, %arg2 : i32
    %c0_i32 = arith.constant 0 : i32
    %c0_i32_0 = arith.constant 0 : i32
    return %arg0, %c0_i32, %1 : i32, i32, i32
  }
  func.func @transform_2(%arg0: i32, %arg1: i32, %arg2: i32) -> (i32, i32, i32, i32) {
    %c0_i32 = arith.constant 0 : i32
    %c0_i32_0 = arith.constant 0 : i32
    %c0_i32_1 = arith.constant 0 : i32
    return %arg0, %arg1, %c0_i32, %c0_i32_0 : i32, i32, i32, i32
  }
}

</mosaic_0001>

<bundles_post_ra>
// kernel: tpu_custom_call.1
= control target key start
LH: loop header
LB: loop body
LE: loop exit
PB: predicated region body
PF: predicated region fallthrough
CT: control target
= control target key end

     0   :  { %7 = vsyncpa [#allocation5], 0  ;;  %s917_s0 = inlined_call_operand.hbm [shape: f32[2,4,256], index: 0, kind: input, shape index: {}]   ;;  %s918_s1 = inlined_call_operand.hbm [shape: s32[2,1,256], index: 1, kind: input, shape index: {}]   ;;  %s919_s2 = inlined_call_operand.vmem [shape: f32[2,1,4,2], index: 2, kind: output, shape index: {}]  }
   0x1   :  { %9 = vsyncpa [#allocation5 + $0x1], 0 }
   0x2   :  { %10 = vsyncpa [#allocation7], 0 }
   0x3   :  { %12 = vsyncpa [#allocation7 + $0x1], 0  ;;  %s736_s9 = smov 0   ;;  %s738_s10 = smov 0  }
   0x4   :  { %s740_s11 = smov 0   ;;  %s742_s12 = smov 0  }
   0x5   :  { %s744_s13 = smov 0   ;;  %s746_s14 = smov 0  }
   0x6 LB: > { %s514_s15 = sadd.s32 4294967295, %s715_s14   ;;  %s37_s16 = sadd.s32 1, %s711_s13  ;;  %s715_s14 = sphi %s746_s14, %s18_s14   ;;  %s711_s13 = sphi %s744_s13, %s933_s13   ;;  %s707_s12 = sphi %s742_s12, %s932_s12   ;;  %s703_s11 = sphi %s740_s11, %s931_s11   ;;  %s699_s10 = sphi %s738_s10, %s930_s10   ;;  %s695_s9 = sphi %s736_s9, %s929_s9  }
   0x7   : > { %p39_p0 = scmp.ge.s32.totalorder %s37_s16, 2  ;;  %s48_s17 = sadd.s32 1, %s703_s11 }
   0x8   : > { %p55_p1 = scmp.ne.s32.totalorder %s703_s11, %s699_s10  ;;  %p56_p2 = scmp.eq.s32.totalorder %s715_s14, 0 }
   0x9   : > { %s935_s16 = smov (%p39_p0, %s37_s16), 0  ;;  %p61_p4 = scmp.ne.s32.totalorder %s699_s10, %s695_s9 }
   0xa   : > { %p772_p3 = por %p56_p2, %p55_p1  ;;  %s43_s19 = ssub.s32 %s711_s13, %s935_s16 }
   0xb   : > { %p62_p5 = scmp.eq.s32.totalorder %s514_s15, 0  ;;  %p46_p6 = scmp.eq.s32.totalorder %s43_s19, 0 }
   0xc   : > { %p543_p8 = scmp.lt.s32.totalorder %s715_s14, 2  ;;  %s788_s22 = sand.u32 1, %s703_s11  }
   0xd   : > { %p779_p7 = por %p62_p5, %p61_p4  ;;  %s530_s23 = sshll.u32 %s711_s13, 7 }
   0xe   : > { %s785_s21 = scalar_select %p46_p6, %s703_s11, %s48_s17  }
   0xf   : > { %s922_s20 = scalar_select %p779_p7, 1, 0 }
  0x10   : > { %s518_s24 = sshll.u32 %s788_s22, 3  ;;  %s795_s27 = scalar_lea.hbm %s917_s0, %s530_s23 }
  0x11   : > { %s147_s28 = scalar_lea.vmem [#allocation4], %s518_s24  ;;  %p799_p9 = pnand %p543_p8, %p772_p3 }
  0x12   : > { %s158_s29 = sshll.u32 %s147_s28, 4  ;;  %s144_s3 = scalar_lea.sflag [#allocation5], %s788_s22  ;;  %s803_s29 = int_to_ptr.vmem [resolvable:$true] %s158_s29 }
  0x13   : > { %s601_s4 = scalar_lea.hbm %s795_s27, 128  ;;  %p603_p13 = pneg %p799_p9 }
  0x14   : > { %p602_p12 = scmp.ne.s32.totalorder %s795_s27, %s601_s4  ;;  %s606_s7 = scalar_lea.hbm %s917_s0, 256 }
  0x15   : > { %p607_p2 = scmp.lt.u32.totalorder %s795_s27, %s917_s0  ;;  %p608_p3 = scmp.lt.u32.totalorder %s606_s7, %s601_s4 }
  0x16   : > { %p604_p0 = pnand %p603_p13, %p602_p12  ;;  %p610_p5 = scmp.lt.u32.totalorder %s601_s4, %s795_s27 }
  0x17   : > { %p609_p4 = por %p608_p3, %p607_p2 }
  0x18   : > { %p605_p1 = pneg %p604_p0 }
  0x19   : > { %p611_p6 = por %p610_p5, %p609_p4 }
  0x1b   : > { %p612_p8 = pnand %p611_p6, %p605_p1 }
  0x1d   : > { %615 = shalt.err (!%p612_p8)
}
  0x1e   : > { %s616_s15 = scalar_lea.vmem %s803_s29, 128  ;;  %s717_s17 = smov [#allocation4]  }
  0x1f   : > { %p617_p12 = scmp.ne.s32.totalorder %s803_s29, %s616_s15  ;;  %s621_s18 = sshll.u32 %s717_s17, 4  ;;  %s622_s18 = int_to_ptr.vmem [resolvable:$false] %s621_s18 }
  0x20   : > { %s623_s19 = scalar_lea.vmem %s622_s18, 256  ;;  %p624_p11 = scmp.lt.s32.totalorder %s803_s29, %s622_s18 }
  0x21   : > { %p619_p0 = pnand %p617_p12, %p603_p13  ;;  %p625_p2 = scmp.lt.s32.totalorder %s623_s19, %s616_s15 }
  0x23   : > { %p620_p10 = pneg %p619_p0  ;;  %p626_p3 = por %p625_p2, %p624_p11 }
  0x25   : > { %p627_p4 = pnand %p626_p3, %p620_p10 }
  0x27   : > { %630 = shalt.err (!%p627_p4)
}
  0x28   : > { %539 = dma.hbm_to_vmem [thread:$0]  (!%p799_p9), %s795_s27, 128, %s803_s29, %s144_s3  }
  0x29   : > { %p924_p1 = scmp.lt.s32.totalorder %s715_s14, 3  ;;  %p925_p5 = scmp.ge.s32.totalorder %s715_s14, 1 }
  0x2a   : > { %s521_s24 = sshll.u32 %s788_s22, 1  ;;  %s531_s25 = sshll.u32 %s711_s13, 5 }
  0x2b   : > { %p837_p6 = pnand %p925_p5, %p924_p1  ;;  %s846_s4 = scalar_lea.hbm %s918_s1, %s531_s25 }
  0x2c   : > { %s169_s5 = scalar_lea.vmem [#allocation6], %s521_s24  ;;  %s166_s27 = scalar_lea.sflag [#allocation7], %s788_s22 }
  0x2d   : > { %s926_s23 = scalar_select %p837_p6, 1, 0 }
  0x2e   : > { %s180_s6 = sshll.u32 %s169_s5, 4  ;;  %s631_s29 = scalar_lea.hbm %s846_s4, 32  ;;  %s181_s6 = int_to_ptr.vmem [resolvable:$true] %s180_s6 }
  0x2f   : > { %p632_p10 = scmp.ne.s32.totalorder %s846_s4, %s631_s29  ;;  %s636_s8 = scalar_lea.hbm %s918_s1, 64 }
  0x30   : > { %p637_p12 = scmp.lt.u32.totalorder %s846_s4, %s918_s1  ;;  %p638_p0 = scmp.lt.u32.totalorder %s636_s8, %s631_s29 }
  0x31   : > { %p634_p11 = pnand %p632_p10, %p603_p13  ;;  %p640_p3 = scmp.lt.u32.totalorder %s631_s29, %s846_s4 }
  0x32   : > { %p639_p2 = por %p638_p0, %p637_p12 }
  0x33   : > { %p635_p8 = pneg %p634_p11 }
  0x34   : > { %p641_p4 = por %p640_p3, %p639_p2 }
  0x36   : > { %p642_p1 = pnand %p641_p4, %p635_p8 }
  0x38   : > { %645 = shalt.err (!%p642_p1)
}
  0x39   : > { %s646_s22 = scalar_lea.vmem %s181_s6, 32  ;;  %s718_s17 = smov [#allocation6]  }
  0x3a   : > { %p647_p5 = scmp.ne.s32.totalorder %s181_s6, %s646_s22  ;;  %s651_s18 = sshll.u32 %s718_s17, 4  ;;  %s652_s18 = int_to_ptr.vmem [resolvable:$false] %s651_s18 }
  0x3b   : > { %s653_s19 = scalar_lea.vmem %s652_s18, 64  ;;  %p654_p7 = scmp.lt.s32.totalorder %s181_s6, %s652_s18 }
  0x3c   : > { %p649_p10 = pnand %p647_p5, %p603_p13  ;;  %p655_p6 = scmp.lt.s32.totalorder %s653_s19, %s646_s22 }
  0x3e   : > { %p650_p11 = pneg %p649_p10  ;;  %p656_p0 = por %p655_p6, %p654_p7 }
  0x40   : > { %p657_p12 = pnand %p656_p0, %p650_p11 }
  0x42   : > { %660 = shalt.err (!%p657_p12)
}
  0x43   : > { %542 = dma.hbm_to_vmem [thread:$0]  (!%p799_p9), %s846_s4, 32, %s181_s6, %s166_s27  }
  0x44   : > { %p927_p8 = scmp.ne.s32.totalorder %s926_s23, 0 }
  0x45   : > { %s191_s24 = sand.u32 (!%p927_p8), 1, %s699_s10   ;;  %p928_p13 = scmp.ne.s32.totalorder (!%p927_p8), %s922_s20, 0 }
  0x46   : > { %189 = sbr.rel (%p927_p8) target bundleno = 314 (0x13a), region = 28  ;;  %s525_s25 = sshll.u32 (!%p927_p8), %s191_s24, 3 }
  0x47   : > { %s192_s26 = scalar_lea.sflag (!%p927_p8), [#allocation5], %s191_s24  ;;  %s195_s28 = scalar_lea.vmem (!%p927_p8), [#allocation4], %s525_s25 }
  0x4d   : > { %686 = dma.done.wait (%p928_p13), %s192_s26, 128  }
  0x4e   : > { %688 = vsyncadd (%p928_p13), %s192_s26, 4294967168  ;;  %s526_s5 = sshll.u32 %s191_s24, 1  ;;  %s201_s29 = scalar_lea.sflag [#allocation7], %s191_s24 }
  0x4f   : > { %s875_s30 = scalar_lea.vmem [#allocation6], %s526_s5 }
  0x50   : > { %690 = dma.done.wait (%p928_p13), %s201_s29, 32  }
  0x51   : > { %692 = vsyncadd (%p928_p13), %s201_s29, 4294967264  ;;  %v719_v0 = vmov 0.0   ;;  %vm277_vm0 = vcmask 1043456   ;;  %v254_v1 = vld [vmem:[%s195_s28] sm:$0xff]  ;;  %v251_v27 = vlaneseq  ;;  %v255_v30 = vld [vmem:[%s875_s30] sm:$0x3] }
  0x52   : > { %247 = vst [vmem:[#allocation2] sm:$0xf] %v719_v0  ;;  %248 = vst [vmem:[#allocation3] sm:$0xf] %v719_v0  ;;  %v275_v2 = vcombine.high %v254_v1, %v254_v1  ;;  %v278_v3 = vsel %vm277_vm0, %v254_v1, -inf  ;;  %vm260_vm1 = vcmp.ne.s32.totalorder %v255_v30, 4294967295 }
  0x53   : > { %v279_v4 = vrot.slane %v278_v3, 4  ;;  %v263_v33 = vshrl.u32 %v251_v27, 7  ;;  %v720_v39 = vmov 0   ;;  %vm331_vm2 = vcmp.gt.s32.totalorder %v255_v30, 0  ;;  %p236_p7 = scmp.lt.s32.totalorder %s707_s12, 1 }
  0x54   : > { %v285_v5 = vsel %vm277_vm0, %v275_v2, -inf  ;;  %v261_v40 = vsel %vm260_vm1, 1, %v720_v39  ;;  %v332_v44 = vsel %vm331_vm2, %v255_v30, 0  ;;  %vm395_vm13 = vcmask 11264  }
  0x55   : > { %v280_v6 = vmax.f32 %v278_v3, %v279_v4  ;;  %v286_v7 = vrot.slane %v285_v5, 4  ;;  %v264_v38 = vsub.s32 0, %v263_v33  ;;  %v268_v42 = vsub.s32 1, %v263_v33  ;;  %s937_s12 = smov (!%p236_p7, %s707_s12), 1 }
  0x56   : > { %vm333_vm3 = vcmp.lt.s32.totalorder %v332_v44, 3  ;;  %s527_s20 = sshll.u32 %s937_s12, 2 }
  0x57   : > { %v281_v8 = vrot.slane %v280_v6, 2  ;;  %v287_v9 = vmax.f32 %v285_v5, %v286_v7  ;;  %v265_v43 = vrot.slane %v261_v40, %v264_v38  ;;  %v269_v45 = vrot.slane %v261_v40, %v268_v42  ;;  %s242_s6 = scalar_lea.vmem %s919_s2, %s527_s20 }
  0x58   : > { %v334_v47 = vsel %vm333_vm3, %v332_v44, 3 }
  0x59   : > { %v282_v10 = vmax.f32 %v280_v6, %v281_v8  ;;  %v288_v11 = vrot.slane %v287_v9, 2  ;;  %vm270_vm4 = vcmp.ne.s32.totalorder %v265_v43, 0  ;;  %vm271_vm5 = vcmp.ne.s32.totalorder %v269_v45, 0  ;;  %v376_v8 = vld [vmem:[#allocation2] sm:$0xf] }
  0x5a   : > { %v345_v48 = vsel %vm270_vm4, 1, %v720_v39  ;;  %v346_v51 = vsel %vm271_vm5, 1, %v720_v39  ;;  %v338_v54 = vrot.slane %v334_v47, %v264_v38  ;;  %v342_v56 = vrot.slane %v334_v47, %v268_v42 }
  0x5b   : > { %v283_v12 = vrot.slane %v282_v10, 1  ;;  %v289_v13 = vmax.f32 %v287_v9, %v288_v11  ;;  %v350_v55 = vrot.slane %v345_v48, %v264_v38  ;;  %v354_v57 = vrot.slane %v346_v51, %v264_v38 }
  0x5c   : > { %vm343_vm6 = vcmp.eq.s32.totalorder %v263_v33, %v338_v54  ;;  %vm344_vm8 = vcmp.eq.s32.totalorder %v263_v33, %v342_v56 }
  0x5d   : > { %v284_v14 = vmax.f32 %v282_v10, %v283_v12  ;;  %v290_v15 = vrot.slane %v289_v13, 1  ;;  %vm355_vm7 = vcmp.eq.s32.totalorder %v350_v55, 1  ;;  %vm356_vm9 = vcmp.eq.s32.totalorder %v354_v57, 1 }
  0x5e   : > { %vm357_vm10 = vmand %vm343_vm6, %vm355_vm7 }
  0x5f   : > { %v291_v16 = vmax.f32 %v289_v13, %v290_v15  ;;  %vm358_vm11 = vmand %vm344_vm8, %vm356_vm9  ;;  %v364_v2 = vsel %vm357_vm10, 1.0, %v719_v0 }
  0x60   : > { %v365_v5 = vsel %vm358_vm11, 1.0, %v719_v0 }
  0x61   : > { %v294_v17 = vcombine.low %v284_v14, %v291_v16  ;;  %v379_v14 = vld [vmem:[#allocation3] sm:$0xf] }
  0x63   : > { %v296_v18 = vsub.f32 %v254_v1, %v294_v17 }
  0x65   : > { %v297_v19 = vmul.f32 1.442695, %v296_v18 }
  0x67   : > { %595 = vpow2.f32 %v297_v19 }
  0x71   : > { %v596_v20 = vpop.eup %595 }
  0x72   : > { %v300_v21 = vcombine.high %v596_v20, %v596_v20  ;;  %v302_v22 = vsel %vm277_vm0, %v596_v20, 0.0 }
  0x73   : > { %v303_v23 = vrot.slane %v302_v22, 4 }
  0x74   : > { %v309_v24 = vsel %vm277_vm0, %v300_v21, 0.0 }
  0x75   : > { %v304_v25 = vadd.f32 %v303_v23, %v302_v22  ;;  %v310_v26 = vrot.slane %v309_v24, 4 }
  0x77   : > { %v305_v28 = vrot.slane %v304_v25, 2  ;;  %v311_v29 = vadd.f32 %v310_v26, %v309_v24 }
  0x79   : > { %v306_v31 = vadd.f32 %v305_v28, %v304_v25  ;;  %v312_v32 = vrot.slane %v311_v29, 2 }
  0x7b   : > { %v307_v34 = vrot.slane %v306_v31, 1  ;;  %v313_v35 = vadd.f32 %v312_v32, %v311_v29 }
  0x7d   : > { %v308_v36 = vadd.f32 %v307_v34, %v306_v31  ;;  %v314_v37 = vrot.slane %v313_v35, 1 }
  0x7f   : > { %v315_v41 = vadd.f32 %v314_v37, %v313_v35  ;;  %597 = vrcp.f32 %v308_v36 }
  0x81   : > { %599 = vrcp.f32 %v315_v41 }
  0x89   : > { %v598_v46 = vpop.eup %597 }
  0x8a   : > { %v318_v49 = vmul.f32 %v598_v46, %v308_v36 }
  0x8b   : > { %v600_v50 = vpop.eup %599 }
  0x8c   : > { %v319_v52 = vmul.f32 %v600_v50, %v315_v41  ;;  %v320_v53 = vsub.f32 2.0, %v318_v49 }
  0x8e   : > { %v321_v58 = vsub.f32 2.0, %v319_v52  ;;  %v322_v59 = vmul.f32 %v598_v46, %v320_v53 }
  0x90   : > { %v323_v60 = vmul.f32 %v600_v50, %v321_v58 }
  0x92   : > { %v326_v61 = vcombine.low %v322_v59, %v323_v60 }
  0x94   : > { %v328_v62 = vmul.f32 %v596_v20, %v326_v61  ;;  %v252_v20 = vand.u32 127, %v251_v27 }
  0x96   : > { %v360_v63 = vcombine.high %v328_v62, %v328_v62  ;;  %v362_v1 = vsel %vm357_vm10, %v328_v62, 0.0  ;;  %v366_v3 = vsel %vm355_vm7, %v328_v62, 0.0  ;;  %vm393_vm12 = vcmp.eq.s32.totalorder %v252_v20, 0 }
  0x97   : > { %v368_v4 = vmul.f32 %v366_v3, %v366_v3 }
  0x98   : > { %v363_v6 = vsel %vm358_vm11, %v360_v63, 0.0  ;;  %v367_v7 = vsel %vm356_vm9, %v360_v63, 0.0 }
  0x99   : > { %v369_v9 = vmul.f32 %v367_v7, %v367_v7  ;;  %v370_v10 = vadd.f32 %v363_v6, %v362_v1  ;;  %v372_v11 = vadd.f32 %v368_v4, %v364_v2 }
  0x9b   : > { %v373_v12 = vadd.f32 %v369_v9, %v365_v5  ;;  %v377_v13 = vadd.f32 %v376_v8, %v370_v10 }
  0x9d   : > { %v374_v15 = vadd.f32 %v373_v12, %v372_v11  ;;  %378 = vst [vmem:[#allocation2] sm:$0xf] %v377_v13 }
  0x9f   : > { %v380_v16 = vadd.f32 %v379_v14, %v374_v15 }
  0xa1   : > { %381 = vst [vmem:[#allocation3] sm:$0xf] %v380_v16 }
  0xa4   : > { %v385_v17 = vld [vmem:[#allocation2] sm:$0xf] }
  0xa5   : > { %v386_v18 = vsel %vm277_vm0, %v385_v17, 0.0 }
  0xa6   : > { %387 = vadd.xlane.f32.xlu0 %v386_v18 }
  0xa8   : > { %v389_v0 = vld [vmem:[#allocation3] sm:$0xf] }
  0xa9   : > { %v390_v19 = vsel %vm277_vm0, %v389_v0, 0.0 }
  0xaa   : > { %391 = vadd.xlane.f32.xlu0 %v390_v19 }
 0x133   : > { %v388_v21 = vpop.xlane.xlu0 %387 }
 0x137   : > { %v392_v22 = vpop.xlane.xlu0 %391 }
 0x138   : > { %v394_v23 = vsel %vm393_vm12, %v388_v21, %v392_v22 }
 0x139   : > { %396 = vst.msk [vmem:[%s242_s6] sm:$0xf] %vm395_vm13, %v394_v23 }
 0x13a PF: > { %s18_s14 = sadd.s32 1, %s715_s14   ;;  %s929_s9 = smov %s699_s10 }
 0x13b   : > { %p15_p9 = scmp.ge.s32.totalorder %s18_s14, 4   ;;  %s930_s10 = smov %s703_s11 }
 0x13c   : > { %s931_s11 = smov %s785_s21  ;;  %s932_s12 = smov %s711_s13 }
 0x13d   : > { %s933_s13 = smov %s935_s16  ;;  %17 = sbr.rel (!%p15_p9) target bundleno = 6 (0x6), region = 89 }
 0x144   :  { %422 = vsyncpa [#allocation5], 1 }
 0x145   :  { %424 = vsyncpa [#allocation5 + $0x1], 1 }
 0x146   :  { %425 = vsyncpa [#allocation7], 1 }
 0x147   :  { %427 = vsyncpa [#allocation7 + $0x1], 1 }

</bundles_post_ra>
